<compile_context>
chip_gen: v6e
topology: v6e:2x2x1
jax: 0.10.0
libtpu: 0.0.40
codegen_flags: <defaults>
</compile_context>

<pallas_src>
import math
import functools

import jax
import jax.numpy as jnp
from jax import lax
from jax.experimental import pallas as pl
from jax.experimental.pallas import tpu as pltpu


def _l2_heatmap_loss_kernel(heat_ref, plane_ref, kz_ref, vis_ref, out_ref,
                            *scratch, J, jt, n_chunks, needs_mask):
    c = pl.program_id(1)
    _, D, HW = heat_ref.shape          # (jt, D, HW) -- leading N dim squeezed

    base = c * jt                      # first (global) joint index of this chunk

    def body(j, carry):
        psum, sq = carry
        # Upcast immediately after load: accumulate in f32 even for bf16 input
        # (v5e has no bf16 VALU).
        h = heat_ref[j].astype(jnp.float32)            # (D, HW)
        if needs_mask:
            # Remainder chunk when jt does not divide J: zero out the joints
            # past J (their VMEM rows are undefined).
            h = jnp.where(base + j < J, h, 0.0)
        return psum + h, sq + jnp.sum(h * h)

    # Single fused pass over the heat block: one load per joint slab feeds both
    # the per-voxel sum and the scalar sum-of-squares.
    part_sum, part_sq = lax.fori_loop(
        0, jt, body,
        (jnp.zeros((D, HW), jnp.float32), jnp.float32(0.0)),
        unroll=True)

    def finalize(hsum, s_total):
        plane = plane_ref[0]                           # (J, HW) flattened ky⊗kx
        kz = kz_ref[0]                                 # (J, D)  depth gaussians
        vis = vis_ref[0]                               # (J, 1)

        # Cross term on the MXU: A[j, d] = sum_hw plane[j, hw] * Hsum[d, hw]
        a = lax.dot_general(
            plane, hsum,
            dimension_numbers=(((1,), (1,)), ((), ())),
            preferred_element_type=jnp.float32)        # (J, D)
        cross = jnp.sum(kz * a, axis=1, keepdims=True)                  # (J, 1)

        # ||T_j||^2 = (sum_d kz^2) * (sum_hw plane^2)
        norm_sq = (jnp.sum(kz * kz, axis=1, keepdims=True) *
                   jnp.sum(plane * plane, axis=1, keepdims=True))       # (J, 1)

        err = s_total - 2.0 * cross + float(J) * norm_sq                # (J, 1)
        loss_n = jnp.sum(vis * err)
        out_ref[...] = jnp.broadcast_to(loss_n, out_ref.shape).astype(out_ref.dtype)

    if n_chunks == 1:
        # Whole sample fits one block: no scratch accumulation path at all.
        finalize(part_sum, part_sq)
    else:
        hsum_ref, sq_ref = scratch     # (D,HW) f32 map + (1,1) f32 scalar

        @pl.when(c == 0)
        def _():
            hsum_ref[...] = part_sum
            sq_ref[0, 0] = part_sq

        @pl.when(c > 0)
        def _():
            hsum_ref[...] = hsum_ref[...] + part_sum
            sq_ref[0, 0] = sq_ref[0, 0] + part_sq

        @pl.when(c == n_chunks - 1)
        def _():
            finalize(hsum_ref[...], sq_ref[0, 0])


def _normal_density_1d(length, mu, sigma):
    # mu: (N, J) -> (N, J, length); matches torch _normal_density_1d.
    x = jnp.arange(length, dtype=jnp.float32)
    k = -0.5 * (x[None, None, :] - mu[:, :, None]) ** 2 / (sigma ** 2)
    return jnp.exp(k) / (sigma * math.sqrt(2.0 * math.pi))


def _round_up(x, m):
    return ((x + m - 1) // m) * m


def _vmem_capacity_bytes():
    try:
        return int(pltpu.get_tpu_info().vmem_capacity_bytes)
    except Exception:
        return 64 * 1024 * 1024   # conservative (v7x-sized) fallback


def _pick_joint_block(J, D, HW, elem_bytes, vmem_cap, joint_block):
    """Choose joints-per-chunk; works for non-divisor / prime J via balanced
    chunks (the kernel masks the remainder chunk, no HBM padding copy)."""
    if joint_block is not None:
        jt = max(1, min(int(joint_block), J))
    else:
        # ~cap/8 per heat buffer (double-buffered by the pipeline):
        # 16 MiB on 128 MiB chips (v5e/v6e), 8 MiB on 64 MiB v7x.
        budget = min(32 * 1024 * 1024, vmem_cap // 8)
        per_joint = max(D * HW * elem_bytes, 1)
        jt = max(1, min(J, budget // per_joint))
        # TODO(synk): if a single joint slab exceeds the budget, also tile D/HW.
    n_chunks = -(-J // jt)
    jt = -(-J // n_chunks)            # balance chunk sizes (e.g. J=17 -> 9+8, not 16+1)
    return jt, n_chunks


def _vmem_limit_bytes(jt, J, D, HW, elem_bytes, n_chunks, cap):
    sub = 32 // elem_bytes            # sublane multiple: 8 for f32, 16 for bf16
    heat_blk = jt * _round_up(D, sub) * _round_up(HW, 128) * elem_bytes
    plane_blk = _round_up(J, 8) * _round_up(HW, 128) * 4
    kz_blk = _round_up(J, 8) * _round_up(D, 128) * 4
    vis_blk = _round_up(J, 8) * 128 * 4
    out_blk = 8 * 128 * 4
    scratch = (_round_up(D, 8) * _round_up(HW, 128) + 8 * 128) * 4 if n_chunks > 1 else 0
    est = 2 * (heat_blk + plane_blk + kz_blk + vis_blk + out_blk) + scratch
    limit = min(cap - (8 << 20), 2 * est + (4 << 20))
    limit = max(limit, 32 << 20)
    return int(min(limit, cap - (4 << 20)))


@functools.partial(jax.jit, static_argnames=("sigma", "joint_block"))
def l2_joint_heatmap_loss(heatmaps, batch_joints, batch_joints_vis,
                          sigma=1.0, joint_block=None):
    # Keep heat in its NATIVE dtype (bf16 stays bf16 -> half the HBM bytes of
    # the bandwidth-bound read). All accumulation is f32 inside the kernel.
    N, J, D, H, W = heatmaps.shape
    HW = H * W
    elem_bytes = jnp.dtype(heatmaps.dtype).itemsize

    mu_x = batch_joints[:, :, 0].astype(jnp.float32)
    mu_y = batch_joints[:, :, 1].astype(jnp.float32)
    mu_z = batch_joints[:, :, 2].astype(jnp.float32)

    kz = _normal_density_1d(D, mu_z, sigma)                       # (N, J, D)
    ky = _normal_density_1d(H, mu_y, sigma)                       # (N, J, H)
    kx = _normal_density_1d(W, mu_x, sigma)                       # (N, J, W)
    # Flattened per-joint (H*W) truth plane -> lane-dense last dim.
    plane = (ky[:, :, :, None] * kx[:, :, None, :]).reshape(N, J, HW)

    heat = heatmaps.reshape(N, J, D, HW)                          # lane-dense, native dtype
    vis = batch_joints_vis.astype(jnp.float32).reshape(N, J, 1)

    cap = _vmem_capacity_bytes()
    jt, n_chunks = _pick_joint_block(J, D, HW, elem_bytes, cap, joint_block)
    needs_mask = (jt * n_chunks != J)
    vmem_limit = _vmem_limit_bytes(jt, J, D, HW, elem_bytes, n_chunks, cap)

    kernel = functools.partial(_l2_heatmap_loss_kernel,
                               J=J, jt=jt, n_chunks=n_chunks, needs_mask=needs_mask)

    scratch_shapes = []
    if n_chunks > 1:
        scratch_shapes = [
            pltpu.VMEM((D, HW), jnp.float32),   # Hsum_n across chunks
            pltpu.VMEM((1, 1), jnp.float32),    # scalar sum of heat^2
        ]

    # TODO(synk): sweep pipeline_mode=pl.Buffered(3) on the heat BlockSpec when
    # VMEM headroom allows (covers the per-sample finalize bubble).
    # TODO(synk): on v7x with N==1, add a second parallel split (e.g. over D)
    # so both TensorCores stay busy.
    out = pl.pallas_call(
        kernel,
        out_shape=jax.ShapeDtypeStruct((N, 1, 128), jnp.float32),
        grid_spec=pltpu.PrefetchScalarGridSpec(
            num_scalar_prefetch=0,
            grid=(N, n_chunks),
            in_specs=[
                pl.BlockSpec((None, jt, D, HW), lambda n, c: (n, c, 0, 0)),  # heat
                pl.BlockSpec((1, J, HW), lambda n, c: (n, 0, 0)),            # plane
                pl.BlockSpec((1, J, D), lambda n, c: (n, 0, 0)),             # kz
                pl.BlockSpec((1, J, 1), lambda n, c: (n, 0, 0)),             # vis
            ],
            out_specs=pl.BlockSpec((1, 1, 128), lambda n, c: (n, 0, 0)),
            scratch_shapes=scratch_shapes,
        ),
        compiler_params=pltpu.CompilerParams(
            dimension_semantics=("parallel", "arbitrary"),
            vmem_limit_bytes=vmem_limit),
    )(heat, plane, kz, vis)

    return jnp.sum(out[:, 0, 0])


if __name__ == "__main__":
    sigma = 1.0

    # Pure-JAX reference mirroring the PyTorch heatmap_loss_3d semantics.
    def ref_loss(heatmaps, joints, vis, sigma):
        heat = heatmaps.astype(jnp.float32)
        N, J, D, H, W = heat.shape
        norm = 1.0 / (sigma * math.sqrt(2.0 * math.pi))
        total = jnp.float32(0.0)
        for n in range(N):
            for j in range(J):
                x, y, z = joints[n, j]
                gz = jnp.exp(-0.5 * (jnp.arange(D, dtype=jnp.float32) - z) ** 2 / sigma ** 2) * norm
                gy = jnp.exp(-0.5 * (jnp.arange(H, dtype=jnp.float32) - y) ** 2 / sigma ** 2) * norm
                gx = jnp.exp(-0.5 * (jnp.arange(W, dtype=jnp.float32) - x) ** 2 / sigma ** 2) * norm
                truth = gz[:, None, None] * gy[None, :, None] * gx[None, None, :]
                err = jnp.sum((heat[n] - truth[None]) ** 2)
                total = total + vis[n, j] * err
        return total

    def make_inputs(N, J, D, H, W, dtype):
        k1, k2, k3 = jax.random.split(jax.random.PRNGKey(0), 3)
        heat = (jax.random.normal(k1, (N, J, D, H, W), dtype=jnp.float32) * 0.1).astype(dtype)
        joints = jax.random.uniform(k2, (N, J, 3), dtype=jnp.float32) \
            * jnp.array([W - 1, H - 1, D - 1], dtype=jnp.float32)
        vis = (jax.random.uniform(k3, (N, J)) > 0.25).astype(jnp.float32)
        return heat, joints, vis

    N, D, H, W = 2, 16, 16, 16
    configs = [
        # (J, dtype,        joint_block, rtol, atol)
        (4, jnp.float32, None, 1e-4, 1e-3),   # auto block -> single-chunk path
        (4, jnp.float32, 2,    1e-4, 1e-3),   # multi-chunk, divides evenly
        (5, jnp.float32, 2,    1e-4, 1e-3),   # non-divisor J -> masked remainder chunk
        (4, jnp.bfloat16, None, 5e-3, 1e-2),  # bf16 ingest, f32 accumulate
    ]
    for J, dtype, jb, rtol, atol in configs:
        heat, joints, vis = make_inputs(N, J, D, H, W, dtype)
        got = jax.block_until_ready(
            l2_joint_heatmap_loss(heat, joints, vis, sigma=sigma, joint_block=jb))
        want = jax.block_until_ready(ref_loss(heat, joints, vis, sigma))
        assert jnp.allclose(got, want, rtol=rtol, atol=atol), \
            (J, str(dtype), jb, float(got), float(want))

    print("KERNEL_OK")
</pallas_src>

<mosaic_0001>
module attributes {stable_mosaic.version = 11 : i64} {
  func.func @_l2_heatmap_loss_kernel(%arg0: i32, %arg1: i32, %arg2: memref<1x4x16x256xf32, #tpu.memory_space<vmem>>, %arg3: memref<1x4x256xf32, #tpu.memory_space<vmem>>, %arg4: memref<1x4x16xf32, #tpu.memory_space<vmem>>, %arg5: memref<1x4x1xf32, #tpu.memory_space<vmem>>, %arg6: memref<1x1x128xf32, #tpu.memory_space<vmem>>) attributes {dimension_semantics = [#tpu.dimension_semantics<parallel>, #tpu.dimension_semantics<arbitrary>], iteration_bounds = array<i64: 2, 1>, scalar_prefetch = 0 : i64, scratch_operands = 0 : i64, tpu.core_type = #tpu.core_type<tc>, window_params = [{transform_indices = @transform_0, window_bounds = array<i64: 1, 4, 16, 256>}, {transform_indices = @transform_1, window_bounds = array<i64: 1, 4, 256>}, {transform_indices = @transform_2, window_bounds = array<i64: 1, 4, 16>}, {transform_indices = @transform_3, window_bounds = array<i64: 1, 4, 1>}, {transform_indices = @transform_4, window_bounds = array<i64: 1, 1, 128>}]} {
    %cst = arith.constant 0.000000e+00 : f32
    %0 = vector.broadcast %cst : f32 to vector<16x256xf32>
    %cst_0 = arith.constant 0.000000e+00 : f32
    %c0_i32 = arith.constant 0 : i32
    %c0 = arith.constant 0 : index
    %1 = arith.index_cast %c0_i32 : i32 to index
    %c0_1 = arith.constant 0 : index
    %c0_2 = arith.constant 0 : index
    %2 = vector.load %arg2[%c0, %1, %c0_1, %c0_2] : memref<1x4x16x256xf32, #tpu.memory_space<vmem>>, vector<1x1x16x256xf32>
    %3 = vector.shape_cast %2 : vector<1x1x16x256xf32> to vector<16x256xf32>
    %4 = arith.addf %0, %3 : vector<16x256xf32>
    %5 = arith.mulf %3, %3 : vector<16x256xf32>
    %6 = vector.shape_cast %5 : vector<16x256xf32> to vector<1x16x256xf32>
    %cst_3 = arith.constant dense<0.000000e+00> : vector<1xf32>
    %7 = vector.multi_reduction <add>, %6, %cst_3 [1, 2] : vector<1x16x256xf32> to vector<1xf32>
    %8 = vector.shape_cast %7 : vector<1xf32> to vector<1x1x1xf32>
    %9 = vector.extract %8[0, 0, 0] : f32 from vector<1x1x1xf32>
    %10 = arith.addf %cst_0, %9 : f32
    %c1_i32 = arith.constant 1 : i32
    %c0_4 = arith.constant 0 : index
    %11 = arith.index_cast %c1_i32 : i32 to index
    %c0_5 = arith.constant 0 : index
    %c0_6 = arith.constant 0 : index
    %12 = vector.load %arg2[%c0_4, %11, %c0_5, %c0_6] : memref<1x4x16x256xf32, #tpu.memory_space<vmem>>, vector<1x1x16x256xf32>
    %13 = vector.shape_cast %12 : vector<1x1x16x256xf32> to vector<16x256xf32>
    %14 = arith.addf %4, %13 : vector<16x256xf32>
    %15 = arith.mulf %13, %13 : vector<16x256xf32>
    %16 = vector.shape_cast %15 : vector<16x256xf32> to vector<1x16x256xf32>
    %cst_7 = arith.constant dense<0.000000e+00> : vector<1xf32>
    %17 = vector.multi_reduction <add>, %16, %cst_7 [1, 2] : vector<1x16x256xf32> to vector<1xf32>
    %18 = vector.shape_cast %17 : vector<1xf32> to vector<1x1x1xf32>
    %19 = vector.extract %18[0, 0, 0] : f32 from vector<1x1x1xf32>
    %20 = arith.addf %10, %19 : f32
    %c2_i32 = arith.constant 2 : i32
    %c0_8 = arith.constant 0 : index
    %21 = arith.index_cast %c2_i32 : i32 to index
    %c0_9 = arith.constant 0 : index
    %c0_10 = arith.constant 0 : index
    %22 = vector.load %arg2[%c0_8, %21, %c0_9, %c0_10] : memref<1x4x16x256xf32, #tpu.memory_space<vmem>>, vector<1x1x16x256xf32>
    %23 = vector.shape_cast %22 : vector<1x1x16x256xf32> to vector<16x256xf32>
    %24 = arith.addf %14, %23 : vector<16x256xf32>
    %25 = arith.mulf %23, %23 : vector<16x256xf32>
    %26 = vector.shape_cast %25 : vector<16x256xf32> to vector<1x16x256xf32>
    %cst_11 = arith.constant dense<0.000000e+00> : vector<1xf32>
    %27 = vector.multi_reduction <add>, %26, %cst_11 [1, 2] : vector<1x16x256xf32> to vector<1xf32>
    %28 = vector.shape_cast %27 : vector<1xf32> to vector<1x1x1xf32>
    %29 = vector.extract %28[0, 0, 0] : f32 from vector<1x1x1xf32>
    %30 = arith.addf %20, %29 : f32
    %c3_i32 = arith.constant 3 : i32
    %c0_12 = arith.constant 0 : index
    %31 = arith.index_cast %c3_i32 : i32 to index
    %c0_13 = arith.constant 0 : index
    %c0_14 = arith.constant 0 : index
    %32 = vector.load %arg2[%c0_12, %31, %c0_13, %c0_14] : memref<1x4x16x256xf32, #tpu.memory_space<vmem>>, vector<1x1x16x256xf32>
    %33 = vector.shape_cast %32 : vector<1x1x16x256xf32> to vector<16x256xf32>
    %34 = arith.addf %24, %33 : vector<16x256xf32>
    %35 = arith.mulf %33, %33 : vector<16x256xf32>
    %36 = vector.shape_cast %35 : vector<16x256xf32> to vector<1x16x256xf32>
    %cst_15 = arith.constant dense<0.000000e+00> : vector<1xf32>
    %37 = vector.multi_reduction <add>, %36, %cst_15 [1, 2] : vector<1x16x256xf32> to vector<1xf32>
    %38 = vector.shape_cast %37 : vector<1xf32> to vector<1x1x1xf32>
    %39 = vector.extract %38[0, 0, 0] : f32 from vector<1x1x1xf32>
    %40 = arith.addf %30, %39 : f32
    %c4_i32 = arith.constant 4 : i32
    %c0_16 = arith.constant 0 : index
    %c0_17 = arith.constant 0 : index
    %c0_18 = arith.constant 0 : index
    %41 = vector.load %arg3[%c0_16, %c0_17, %c0_18] : memref<1x4x256xf32, #tpu.memory_space<vmem>>, vector<1x4x256xf32>
    %42 = vector.shape_cast %41 : vector<1x4x256xf32> to vector<4x256xf32>
    %c0_19 = arith.constant 0 : index
    %c0_20 = arith.constant 0 : index
    %c0_21 = arith.constant 0 : index
    %43 = vector.load %arg4[%c0_19, %c0_20, %c0_21] : memref<1x4x16xf32, #tpu.memory_space<vmem>>, vector<1x4x16xf32>
    %44 = vector.shape_cast %43 : vector<1x4x16xf32> to vector<4x16xf32>
    %c0_22 = arith.constant 0 : index
    %c0_23 = arith.constant 0 : index
    %c0_24 = arith.constant 0 : index
    %45 = vector.load %arg5[%c0_22, %c0_23, %c0_24] : memref<1x4x1xf32, #tpu.memory_space<vmem>>, vector<1x4x1xf32>
    %46 = vector.shape_cast %45 : vector<1x4x1xf32> to vector<4x1xf32>
    %cst_25 = arith.constant dense<0.000000e+00> : vector<4x16xf32>
    %47 = tpu.matmul %42, %34, %cst_25 {dimension_numbers = #tpu.dot_dimension_numbers<[1], [1], [0], [0], [0, 0, 1, 0], [], []>} : vector<4x256xf32>, vector<16x256xf32>, vector<4x16xf32> -> vector<4x16xf32>
    %48 = arith.mulf %44, %47 : vector<4x16xf32>
    %cst_26 = arith.constant dense<0.000000e+00> : vector<4xf32>
    %49 = vector.multi_reduction <add>, %48, %cst_26 [1] : vector<4x16xf32> to vector<4xf32>
    %50 = vector.shape_cast %49 : vector<4xf32> to vector<4x1xf32>
    %51 = arith.mulf %44, %44 : vector<4x16xf32>
    %cst_27 = arith.constant dense<0.000000e+00> : vector<4xf32>
    %52 = vector.multi_reduction <add>, %51, %cst_27 [1] : vector<4x16xf32> to vector<4xf32>
    %53 = vector.shape_cast %52 : vector<4xf32> to vector<4x1xf32>
    %54 = arith.mulf %42, %42 : vector<4x256xf32>
    %cst_28 = arith.constant dense<0.000000e+00> : vector<4xf32>
    %55 = vector.multi_reduction <add>, %54, %cst_28 [1] : vector<4x256xf32> to vector<4xf32>
    %56 = vector.shape_cast %55 : vector<4xf32> to vector<4x1xf32>
    %57 = arith.mulf %53, %56 : vector<4x1xf32>
    %cst_29 = arith.constant 2.000000e+00 : f32
    %58 = vector.broadcast %cst_29 : f32 to vector<4x1xf32>
    %59 = arith.mulf %58, %50 : vector<4x1xf32>
    %60 = vector.broadcast %40 : f32 to vector<4x1xf32>
    %61 = arith.subf %60, %59 : vector<4x1xf32>
    %cst_30 = arith.constant 4.000000e+00 : f32
    %62 = vector.broadcast %cst_30 : f32 to vector<4x1xf32>
    %63 = arith.mulf %62, %57 : vector<4x1xf32>
    %64 = arith.addf %61, %63 : vector<4x1xf32>
    %65 = arith.mulf %46, %64 : vector<4x1xf32>
    %66 = vector.shape_cast %65 : vector<4x1xf32> to vector<1x4x1xf32>
    %cst_31 = arith.constant dense<0.000000e+00> : vector<1xf32>
    %67 = vector.multi_reduction <add>, %66, %cst_31 [1, 2] : vector<1x4x1xf32> to vector<1xf32>
    %68 = vector.shape_cast %67 : vector<1xf32> to vector<1x1x1xf32>
    %69 = vector.extract %68[0, 0, 0] : f32 from vector<1x1x1xf32>
    %70 = vector.broadcast %69 : f32 to vector<1x1x128xf32>
    %c0_32 = arith.constant 0 : index
    %c0_33 = arith.constant 0 : index
    %c0_34 = arith.constant 0 : index
    %71 = vector.load %arg6[%c0_32, %c0_33, %c0_34] : memref<1x1x128xf32, #tpu.memory_space<vmem>>, vector<1x1x128xf32>
    tpu.vector_store %arg6[%c0_32, %c0_33, %c0_34], %70 {strides = array<i32>} : memref<1x1x128xf32, #tpu.memory_space<vmem>>, vector<1x1x128xf32>,
    return
  }
  func.func @transform_0(%arg0: i32, %arg1: i32) -> (i32, i32, i32, i32) {
    %c0_i32 = arith.constant 0 : i32
    %c0_i32_0 = arith.constant 0 : i32
    %c0_i32_1 = arith.constant 0 : i32
    return %arg0, %arg1, %c0_i32, %c0_i32_0 : i32, i32, i32, i32
  }
  func.func @transform_1(%arg0: i32, %arg1: i32) -> (i32, i32, i32) {
    %c0_i32 = arith.constant 0 : i32
    %c0_i32_0 = arith.constant 0 : i32
    %c0_i32_1 = arith.constant 0 : i32
    return %arg0, %c0_i32, %c0_i32_0 : i32, i32, i32
  }
  func.func @transform_2(%arg0: i32, %arg1: i32) -> (i32, i32, i32) {
    %c0_i32 = arith.constant 0 : i32
    %c0_i32_0 = arith.constant 0 : i32
    %c0_i32_1 = arith.constant 0 : i32
    return %arg0, %c0_i32, %c0_i32_0 : i32, i32, i32
  }
  func.func @transform_3(%arg0: i32, %arg1: i32) -> (i32, i32, i32) {
    %c0_i32 = arith.constant 0 : i32
    %c0_i32_0 = arith.constant 0 : i32
    %c0_i32_1 = arith.constant 0 : i32
    return %arg0, %c0_i32, %c0_i32_0 : i32, i32, i32
  }
  func.func @transform_4(%arg0: i32, %arg1: i32) -> (i32, i32, i32) {
    %c0_i32 = arith.constant 0 : i32
    %c0_i32_0 = arith.constant 0 : i32
    %c0_i32_1 = arith.constant 0 : i32
    return %arg0, %c0_i32, %c0_i32_0 : i32, i32, i32
  }
}

</mosaic_0001>

<bundles_post_ra>
// kernel: l2_joint_heatmap_loss.1
= control target key start
LH: loop header
LB: loop body
LE: loop exit
PB: predicated region body
PF: predicated region fallthrough
CT: control target
= control target key end

     0   :  { %s708_s15 = smov 0   ;;  %s710_s16 = smov 0   ;;  %s787_s0 = inlined_call_operand.vmem [shape: f32[2,4,16,256], index: 0, kind: input, shape index: {}]   ;;  %s788_s1 = inlined_call_operand.vmem [shape: f32[2,4,256], index: 1, kind: input, shape index: {}]   ;;  %s789_s2 = inlined_call_operand.vmem [shape: f32[2,4,16], index: 2, kind: input, shape index: {}]   ;;  %s790_s3 = inlined_call_operand.vmem [shape: f32[2,4,1], index: 3, kind: input, shape index: {}]   ;;  %s791_s4 = inlined_call_operand.vmem [shape: f32[2,1,128], index: 4, kind: output, shape index: {}]  }
   0x1   :  { %s712_s17 = smov 0  }
   0x2 LB: > { %s26_s18 = sadd.s32 1, %s677_s16  ;;  %p601_p0 = scmp.ge.s32.totalorder %s681_s17, 1  ;;  %s681_s17 = sphi %s712_s17, %s14_s17   ;;  %s677_s16 = sphi %s710_s16, %s793_s16   ;;  %s673_s15 = sphi %s708_s15, %s792_s15  }
   0x3   : > { %p28_p1 = scmp.ge.s32.totalorder %s26_s18, 2  ;;  %p210_p2 = scmp.lt.s32.totalorder %s681_s17, 3 }
   0x5   : > { %s795_s18 = smov (%p28_p1, %s26_s18), 0  ;;  %p211_p3 = pnand %p601_p0, %p210_p2 }
   0x6   : > { %p253_p4 = scmp.lt.s32.totalorder (!%p211_p3), %s673_s15, 1 }
   0x7   : > { %214 = sbr.rel (%p211_p3) target bundleno = 580 (0x244), region = 36 }
   0xc   : > { %s797_s15 = smov (!%p253_p4, %s673_s15), 1  ;;  %vm459_vm0 = vcmask 125952   ;;  %vm471_vm1 = vcmask 1043456   ;;  %vm484_vm2 = vcmask 3072  }
   0xd   : > { %s622_s19 = sshll.u32 %s797_s15, 7  ;;  %s623_s23 = sshll.u32 %s797_s15, 3 }
   0xe   : > { %s732_s22 = scalar_lea.vmem %s787_s0, %s622_s19  ;;  %s267_s26 = scalar_lea.vmem %s788_s1, %s623_s23 }
   0xf   : > { %v282_v0 = vld [vmem:[%s732_s22 + $0x18] sm:$0xff]  ;;  %v281_v5 = vld [vmem:[%s732_s22 + $0x10] sm:$0xff]  ;;  %v280_v11 = vld [vmem:[%s732_s22 + $0x8] sm:$0xff]  ;;  %s606_s27 = sshll.u32 %s797_s15, 2  ;;  %s278_s21 = scalar_lea.vmem %s791_s4, %s797_s15 }
  0x10   : > { %v611_v1 = vld [vmem:[%s732_s22 + $0x38] sm:$0xff]  ;;  %v610_v6 = vld [vmem:[%s732_s22 + $0x30] sm:$0xff]  ;;  %v290_v7 = vmul.f32 %v282_v0, %v282_v0  ;;  %v289_v12 = vmul.f32 %v281_v5, %v281_v5  ;;  %v609_v17 = vld [vmem:[%s732_s22 + $0x28] sm:$0xff]  ;;  %v288_v20 = vmul.f32 %v280_v11, %v280_v11  ;;  %s271_s30 = scalar_lea.vmem %s789_s2, %s606_s27  ;;  %s275_s14 = scalar_lea.vmem %s790_s3, %s606_s27 }
  0x11   : > { %v615_v2 = vld [vmem:[%s732_s22 + $0x58] sm:$0xff]  ;;  %v312_v3 = vadd.f32 %v611_v1, %v282_v0  ;;  %v311_v8 = vadd.f32 %v610_v6, %v281_v5  ;;  %v614_v9 = vld [vmem:[%s732_s22 + $0x50] sm:$0xff]  ;;  %v315_v14 = vmul.f32 %v610_v6, %v610_v6  ;;  %v613_v18 = vld [vmem:[%s732_s22 + $0x48] sm:$0xff]  ;;  %v310_v23 = vadd.f32 %v609_v17, %v280_v11 }
  0x12   : > { %v619_v4 = vld [vmem:[%s732_s22 + $0x78] sm:$0xff]  ;;  %v618_v10 = vld [vmem:[%s732_s22 + $0x70] sm:$0xff]  ;;  %v342_v13 = vmul.f32 %v615_v2, %v615_v2  ;;  %v617_v19 = vld [vmem:[%s732_s22 + $0x68] sm:$0xff]  ;;  %v341_v21 = vmul.f32 %v614_v9, %v614_v9  ;;  %v340_v28 = vmul.f32 %v613_v18, %v613_v18  ;;  %v314_v44 = vmul.f32 %v609_v17, %v609_v17 }
  0x13   : > { %v338_v15 = vadd.f32 %v615_v2, %v312_v3  ;;  %v367_v16 = vmul.f32 %v618_v10, %v618_v10  ;;  %v337_v22 = vadd.f32 %v614_v9, %v311_v8  ;;  %v366_v24 = vmul.f32 %v617_v19, %v617_v19  ;;  %v279_v25 = vld [vmem:[%s732_s22] sm:$0xff] }
  0x14   : > { %v608_v26 = vld [vmem:[%s732_s22 + $0x20] sm:$0xff]  ;;  %v287_v33 = vmul.f32 %v279_v25, %v279_v25  ;;  %v336_v36 = vadd.f32 %v613_v18, %v310_v23  ;;  %v368_v46 = vmul.f32 %v619_v4, %v619_v4  ;;  %v316_v50 = vmul.f32 %v611_v1, %v611_v1 }
  0x15   : > { %v612_v27 = vld [vmem:[%s732_s22 + $0x40] sm:$0xff]  ;;  %v364_v29 = vadd.f32 %v619_v4, %v338_v15  ;;  %v309_v30 = vadd.f32 %v608_v26, %v279_v25  ;;  %v363_v35 = vadd.f32 %v618_v10, %v337_v22  ;;  %v313_v42 = vmul.f32 %v608_v26, %v608_v26 }
  0x16   : > { %v616_v31 = vld [vmem:[%s732_s22 + $0x60] sm:$0xff]  ;;  %v339_v34 = vmul.f32 %v612_v27, %v612_v27  ;;  %v291_v40 = vadd.f32 %v288_v20, %v287_v33  ;;  %v362_v43 = vadd.f32 %v617_v19, %v336_v36 }
  0x17   : > { %v754_v32 = vld [vmem:[%s267_s26] sm:$0xff]  ;;  %v365_v37 = vmul.f32 %v616_v31, %v616_v31  ;;  %416 = vmatprep.subr.mxu0 %v364_v29  ;;  %v335_v39 = vadd.f32 %v612_v27, %v309_v30  ;;  %v317_v51 = vadd.f32 %v314_v44, %v313_v42 }
  0x18   : > { %v386_v38 = vcombine.high %v754_v32, %v754_v32  ;;  %v343_v41 = vadd.f32 %v340_v28, %v339_v34  ;;  %417 = vmatpush1.xpose.msra.mxu0 %v363_v35  ;;  %v292_v48 = vadd.f32 %v291_v40, %v289_v12  ;;  %v383_v58 = vld [vmem:[%s271_s30] sm:$0xf]  ;;  %v467_v25 = vmul.f32 %v754_v32, %v754_v32 }
  0x19   : > { %v369_v45 = vadd.f32 %v366_v24, %v365_v37  ;;  %v361_v47 = vadd.f32 %v616_v31, %v335_v39  ;;  %418 = vmatprep.subr.mxu0 %v362_v43  ;;  %v318_v55 = vadd.f32 %v317_v51, %v315_v14  ;;  %v463_v59 = vmul.f32 %v383_v58, %v383_v58  ;;  %v384_v42 = vld [vmem:[%s275_s14] sm:$0xf] }
  0x1a   : > { %452 = vmatprep.mubr.f32.mxu0 %v386_v38  ;;  %v344_v49 = vadd.f32 %v343_v41, %v341_v21  ;;  %v293_v53 = vadd.f32 %v292_v48, %v290_v7  ;;  %v469_v26 = vcombine.high %v467_v25, %v467_v25  ;;  %v472_v29 = vsel %vm471_vm1, %v467_v25, 0.0 }
  0x1b   : > { %v370_v52 = vadd.f32 %v369_v45, %v367_v16  ;;  %v319_v57 = vadd.f32 %v318_v55, %v316_v50  ;;  %v464_v60 = vsel %vm459_vm0, %v463_v59, 0.0 }
  0x1c   : > { %v345_v54 = vadd.f32 %v344_v49, %v342_v13  ;;  %419 = vmatpush1.xpose.msra.mxu0 %v361_v47  ;;  %294 = vadd.xlane.f32.xlu0 %v293_v53  ;;  %v473_v30 = vsel %vm471_vm1, %v469_v26, 0.0 }
  0x1d   : > { %v371_v56 = vadd.f32 %v370_v52, %v368_v46  ;;  %v474_v34 = vadd.f32 %v473_v30, %v472_v29 }
  0x1e   : > { %346 = vadd.xlane.f32.xlu1 %v345_v54 }
  0x1f   : > { %453 = vmatmul.mubr.f32.vlgmr.msra.gmra.mxu0 %v754_v32 }
  0x20   : > { %320 = vadd.xlane.f32.xlu0 %v319_v57 }
  0x22   : > { %372 = vadd.xlane.f32.xlu1 %v371_v56 }
  0x26   : > { %465 = vadd.xlane.f32.xlu1 %v464_v60 }
  0xa5   : > { %v295_v61 = vpop.xlane.xlu0 %294 }
  0xa6   : > { %v296_v63 = vrot.slane %v295_v61, 4 }
  0xa7   : > { %v347_v62 = vpop.xlane.xlu1 %346 }
  0xa8   : > { %v348_v0 = vrot.slane %v347_v62, 4  ;;  %v297_v1 = vadd.f32 %v296_v63, %v295_v61 }
  0xa9   : > { %v321_v3 = vpop.xlane.xlu0 %320 }
  0xaa   : > { %v349_v2 = vadd.f32 %v348_v0, %v347_v62  ;;  %v298_v5 = vrot.slane %v297_v1, 2  ;;  %v322_v7 = vrot.slane %v321_v3, 4 }
  0xab   : > { %v373_v4 = vpop.xlane.xlu1 %372 }
  0xac   : > { %v350_v6 = vrot.slane %v349_v2, 2  ;;  %v374_v8 = vrot.slane %v373_v4, 4  ;;  %v323_v9 = vadd.f32 %v322_v7, %v321_v3  ;;  %v299_v11 = vadd.f32 %v298_v5, %v297_v1 }
  0xae   : > { %v375_v10 = vadd.f32 %v374_v8, %v373_v4  ;;  %v351_v12 = vadd.f32 %v350_v6, %v349_v2  ;;  %v324_v13 = vrot.slane %v323_v9, 2  ;;  %v300_v15 = vrot.slane %v299_v11, 1 }
  0xaf   : > { %v466_v35 = vpop.xlane.xlu1 %465 }
  0xb0   : > { %v376_v14 = vrot.slane %v375_v10, 2  ;;  %v352_v16 = vrot.slane %v351_v12, 1  ;;  %v301_v17 = vadd.f32 %v300_v15, %v299_v11  ;;  %v325_v18 = vadd.f32 %v324_v13, %v323_v9 }
  0xb2   : > { %v377_v19 = vadd.f32 %v376_v14, %v375_v10  ;;  %624 = vpush %v301_v17  ;;  %v326_v20 = vrot.slane %v325_v18, 1  ;;  %v353_v22 = vadd.f32 %v352_v16, %v351_v12 }
  0xb4   : > { %v378_v21 = vrot.slane %v377_v19, 1  ;;  %v327_v23 = vadd.f32 %v326_v20, %v325_v18 }
  0xb6   : > { %v379_v24 = vadd.f32 %v378_v21, %v377_v19  ;;  %626 = vpush %v327_v23 }
  0xb7   : > { %628 = vpush %v353_v22 }
  0xb8   : > { %630 = vpush %v379_v24 }
  0xdf   : > { %v454_v27 = vpop.f32.mrf.mxu0 }
  0xe0   : > { %v458_v28 = vmul.f32 %v454_v27, %v383_v58 }
  0xe1   : > { %v456_v31 = vpop.f32.mrf.mxu0 }
  0xe2   : > { %v460_v33 = vsel %vm459_vm0, %v458_v28, 0.0 }
  0xe3   : > { %461 = vadd.xlane.f32.xlu0 %v460_v33  ;;  %s625_s5 = spop %624 }
  0xe7   : > { %475 = vadd.xlane.f32.xlu0 %v474_v34  ;;  %s627_s6 = spop %626 }
  0xe8   : > { %s329_s7 = sadd.f32 %s627_s6, %s625_s5  ;;  %s629_s8 = spop %628 }
  0xe9   : > { %s631_s10 = spop %630 }
  0xea   : > { %s355_s9 = sadd.f32 %s629_s8, %s329_s7 }
  0xec   : > { %s381_s11 = sadd.f32 %s631_s10, %s355_s9 }
  0xee   : > { %v479_v39 = vstv %s381_s11 }
 0x16c   : > { %v462_v32 = vpop.xlane.xlu0 %461 }
 0x16d   : > { %v478_v36 = vmul.f32 2.0, %v462_v32 }
 0x16f   : > { %v480_v40 = vsub.f32 %v479_v39, %v478_v36 }
 0x170   : > { %v476_v37 = vpop.xlane.xlu0 %475 }
 0x171   : > { %v477_v38 = vmul.f32 %v476_v37, %v466_v35 }
 0x173   : > { %v481_v41 = vmul.f32 4.0, %v477_v38 }
 0x175   : > { %v482_v43 = vadd.f32 %v481_v41, %v480_v40 }
 0x177   : > { %v483_v44 = vmul.f32 %v482_v43, %v384_v42 }
 0x179   : > { %v485_v45 = vsel %vm484_vm2, %v483_v44, 0.0 }
 0x17a   : > { %486 = vadd.xlane.f32.xlu1 %v485_v45 }
 0x203   : > { %v487_v46 = vpop.xlane.xlu1 %486 }
 0x204   : > { %v488_v47 = vrot.slane %v487_v46, 4 }
 0x206   : > { %v489_v48 = vadd.f32 %v488_v47, %v487_v46 }
 0x208   : > { %v490_v49 = vrot.slane %v489_v48, 2 }
 0x20a   : > { %v491_v50 = vadd.f32 %v490_v49, %v489_v48 }
 0x20c   : > { %v492_v51 = vrot.slane %v491_v50, 1 }
 0x20e   : > { %v493_v52 = vadd.f32 %v492_v51, %v491_v50 }
 0x210   : > { %632 = vpush %v493_v52 }
 0x241   : > { %s633_s22 = spop %632 }
 0x242   : > { %v495_v53 = vstv %s633_s22 }
 0x243   : > { %496 = vst [vmem:[%s278_s21] sm:$0x1] %v495_v53 }
 0x244 PF: > { %s14_s17 = sadd.s32 1, %s681_s17   ;;  %s792_s15 = smov %s677_s16 }
 0x245   : > { %p11_p5 = scmp.ge.s32.totalorder %s14_s17, 4   ;;  %s793_s16 = smov %s795_s18 }
 0x247   :  { %13 = sbr.rel (!%p11_p5) target bundleno = 2 (0x2), region = 78 }

</bundles_post_ra>
